<compile_context>
chip_gen: v7x
topology: tpu7x:2x2x1
jax: 0.10.0
libtpu: 0.0.40
codegen_flags: <defaults>
</compile_context>

<pallas_src>
from functools import partial

import jax
import jax.numpy as jnp
from jax.experimental import pallas as pl
from jax.experimental.pallas import tpu as pltpu


# ----------------------------------------------------------------------------
# Fused kernel: GCN stack + (folded) channel average + LSTM + final linear.
# ----------------------------------------------------------------------------
def _make_fused_kernel(num_stacks, T, B, H):
    def kernel(x_ref, *refs):
        k_refs = refs[:num_stacks]
        (wxg_ref, whh_ref, b_ref, wfc_ref, bfc_ref, o_ref) = refs[num_stacks:]

        # --- GCN stack -------------------------------------------------------
        # Activations stay as one lane-dense slab h[t*B + b, n*C + c]
        # (slice-row-major, time-major rows).  One GCN layer over every (b, t)
        # slice is a single MXU matmul against k_refs[s] = kron(A_hat^T, W_s).
        # bf16 operands, f32 accumulation, f32 ReLU.
        h = x_ref[...]                                         # bf16 (T*B, N*Cin)
        for s in range(num_stacks):
            h = jnp.maximum(
                jnp.dot(h, k_refs[s][...], preferred_element_type=jnp.float32),
                0.0,
            ).astype(jnp.bfloat16)

        # --- channel average + LSTM input projection (folded) -----------------
        # wxg = kron(I_N, 1/C) @ W_ih^T (with g-gate columns pre-scaled by 2),
        # so this single matmul yields the hoisted per-step input gates for all
        # T steps at once.  Rows are already time-major -> no transpose needed.
        gates_x = (
            jnp.dot(h, wxg_ref[...], preferred_element_type=jnp.float32)
            + b_ref[...]
        )                                                      # f32 (T*B, 4H)

        # --- LSTM recurrence ---------------------------------------------------
        whh = whh_ref[...]                                     # bf16 (H, 4H)
        h_t = jnp.zeros((B, H), jnp.float32)
        c_t = jnp.zeros((B, H), jnp.float32)
        # T is small and static -> fully unroll the serial recurrence.
        for t in range(T):
            gates = gates_x[t * B:(t + 1) * B, :] + jnp.dot(
                h_t.astype(jnp.bfloat16), whh,
                preferred_element_type=jnp.float32)            # f32 (B, 4H)
            # One full-lane logistic per step; g gate recovered via
            # tanh(z) = 2*sigmoid(2z) - 1 (pre-activation already scaled by 2).
            s_all = jax.nn.sigmoid(gates)
            i_g = s_all[:, 0 * H:1 * H]
            f_g = s_all[:, 1 * H:2 * H]
            g_g = 2.0 * s_all[:, 2 * H:3 * H] - 1.0
            o_g = s_all[:, 3 * H:4 * H]
            c_t = f_g * c_t + i_g * g_g
            h_t = o_g * jnp.tanh(c_t)

        # --- final linear (lane-dense, zero-padded to 128 classes) ------------
        o_ref[...] = (
            jnp.dot(h_t, wfc_ref[...], preferred_element_type=jnp.float32)
            + bfc_ref[...]
        )

    return kernel


# ----------------------------------------------------------------------------
# One-time preprocessing (run when params / A are set, NOT per forward).
# ----------------------------------------------------------------------------
def a_tilde(A):
    """D^(-1/2) A D^(-1/2) with tol, mirroring GCN_p_LSTM.A_tilde."""
    deg = jnp.sum(A, axis=1)
    tol = 0.0001
    d = (deg + tol) ** (-0.5)
    frac = jnp.diag(d)
    return jnp.matmul(frac, jnp.matmul(A, frac)).astype(jnp.float32)


def prepare_gcn_lstm(A, params):
    """Precompute kernel constants once (adjacency folding, kron slabs, gate
    pre-scaling, bias fusion, output padding). Returns a pytree of arrays."""
    N = A.shape[0]
    A = A.astype(jnp.float32) + jnp.eye(N, dtype=jnp.float32)   # self-loops
    A_hat = a_tilde(A)

    # Fold A_hat into each GCN weight: vec_r(A X W) = vec_r(X) @ (A^T kron W).
    ks = tuple(
        jnp.kron(A_hat.T, w.astype(jnp.float32)).astype(jnp.bfloat16)
        for w in params["gcn_ws"]
    )

    # Channel-average matrix folded straight into the LSTM input projection.
    c_last = params["gcn_ws"][-1].shape[1]
    m_avg = jnp.kron(jnp.eye(N, dtype=jnp.float32),
                     jnp.full((c_last, 1), 1.0 / c_last, jnp.float32))  # (N*C, N)

    H = params["w_hh"].shape[1]
    # Pre-scale the g-gate columns by 2 so a single sigmoid serves all gates.
    gate_scale = jnp.concatenate([
        jnp.ones((2 * H,), jnp.float32),
        2.0 * jnp.ones((H,), jnp.float32),
        jnp.ones((H,), jnp.float32),
    ])
    wih_t = params["w_ih"].T.astype(jnp.float32) * gate_scale[None, :]   # (N, 4H)
    wxg = jnp.dot(m_avg, wih_t).astype(jnp.bfloat16)                     # (N*C, 4H)
    whh_t = (params["w_hh"].T.astype(jnp.float32)
             * gate_scale[None, :]).astype(jnp.bfloat16)                 # (H, 4H)
    b = ((params["b_ih"] + params["b_hh"]).astype(jnp.float32)
         * gate_scale).reshape(1, 4 * H)                                 # (1, 4H)

    # Lane-dense final linear: zero-pad num_class up to a multiple of 128.
    num_class = params["w_fc"].shape[0]
    pad = max(128, ((num_class + 127) // 128) * 128)
    wfc_t = jnp.zeros((H, pad), jnp.float32).at[:, :num_class].set(
        params["w_fc"].T.astype(jnp.float32))
    bfc = jnp.zeros((1, pad), jnp.float32).at[:, :num_class].set(
        params["b_fc"].astype(jnp.float32))

    return dict(ks=ks, wxg=wxg, whh=whh_t, b=b, wfc=wfc_t, bfc=bfc)


# ----------------------------------------------------------------------------
# Per-forward wrapper: feature layout + one pallas_call.
# ----------------------------------------------------------------------------
@partial(jax.jit, static_argnums=(2,))
def gcn_p_lstm_forward(features, prepped, num_class):
    """features: (B, T, N, Cin) -> logits (B, num_class)."""
    # TODO(synk): average=False (per-channel GCN output) is not implemented;
    # the module wires Lstm_block(input_dim=num_nodes), requiring average=True.
    B, T, N, Cin = features.shape
    TB = T * B

    # Slice-row-major slab: x[t*B + b, n*Cin + c]; time-major rows keep each
    # LSTM step's B rows contiguous.  bf16 for native MXU matmuls.
    x = (jnp.transpose(features.astype(jnp.float32), (1, 0, 2, 3))
         .reshape(TB, N * Cin).astype(jnp.bfloat16))

    ks = prepped["ks"]
    H = prepped["whh"].shape[0]
    pad = prepped["wfc"].shape[1]

    kernel = _make_fused_kernel(len(ks), T, B, H)
    vmem = pl.BlockSpec(memory_space=pltpu.MemorySpace.VMEM)
    n_in = 1 + len(ks) + 5
    out = pl.pallas_call(
        kernel,
        out_shape=jax.ShapeDtypeStruct((B, pad), jnp.float32),
        in_specs=[vmem] * n_in,
        out_specs=vmem,
    )(x, *ks, prepped["wxg"], prepped["whh"], prepped["b"],
      prepped["wfc"], prepped["bfc"])
    return out[:, :num_class]


# ----------------------------------------------------------------------------
# Pure-JAX reference (for correctness checking only).
# ----------------------------------------------------------------------------
def _reference_forward(features, A, params):
    B, T, N, _ = features.shape
    A = A.astype(jnp.float32) + jnp.eye(N, dtype=jnp.float32)
    A_hat = a_tilde(A)
    hi = jax.lax.Precision.HIGHEST

    h = features.astype(jnp.float32)                       # (B, T, N, C)
    for w in params["gcn_ws"]:
        h = jax.nn.relu(jnp.einsum("mn,btnc,cd->btmd", A_hat, h, w, precision=hi))
    sig = jnp.mean(h, axis=-1)                             # (B, T, N)

    H = params["w_hh"].shape[1]
    h_t = jnp.zeros((B, H), jnp.float32)
    c_t = jnp.zeros((B, H), jnp.float32)
    for t in range(T):
        gates = (jnp.dot(sig[:, t, :], params["w_ih"].T, precision=hi)
                 + jnp.dot(h_t, params["w_hh"].T, precision=hi)
                 + params["b_ih"] + params["b_hh"])
        i = jax.nn.sigmoid(gates[:, 0 * H:1 * H])
        f = jax.nn.sigmoid(gates[:, 1 * H:2 * H])
        g = jnp.tanh(gates[:, 2 * H:3 * H])
        o = jax.nn.sigmoid(gates[:, 3 * H:4 * H])
        c_t = f * c_t + i * g
        h_t = o * jnp.tanh(c_t)
    return jnp.dot(h_t, params["w_fc"].T, precision=hi) + params["b_fc"]


def init_params(key, num_class, num_nodes, in_dim, out_dim, hidden_dim, num_stacks):
    keys = jax.random.split(key, num_stacks + 5)
    dims = [in_dim] + [out_dim] * num_stacks
    gcn_ws = [
        0.5 * jax.random.normal(keys[s], (dims[s], dims[s + 1]), jnp.float32)
        for s in range(num_stacks)
    ]
    w_ih = 0.5 * jax.random.normal(keys[num_stacks], (4 * hidden_dim, num_nodes), jnp.float32)
    w_hh = 0.5 * jax.random.normal(keys[num_stacks + 1], (4 * hidden_dim, hidden_dim), jnp.float32)
    b_ih = 0.1 * jax.random.normal(keys[num_stacks + 2], (4 * hidden_dim,), jnp.float32)
    b_hh = 0.1 * jax.random.normal(keys[num_stacks + 3], (4 * hidden_dim,), jnp.float32)
    w_fc = 0.5 * jax.random.normal(keys[num_stacks + 4], (num_class, hidden_dim), jnp.float32)
    b_fc = jnp.zeros((num_class,), jnp.float32)
    return dict(gcn_ws=gcn_ws, w_ih=w_ih, w_hh=w_hh, b_ih=b_ih, b_hh=b_hh,
                w_fc=w_fc, b_fc=b_fc)


if __name__ == "__main__":
    # Small shapes implied by the forward: (batch, time, num_nodes, in_channel)
    B, T, N, Cin = 2, 8, 16, 4
    out_dim, hidden_dim, num_class, num_stacks = 8, 32, 5, 3

    key = jax.random.PRNGKey(0)
    k_feat, k_adj, k_par = jax.random.split(key, 3)

    features = jax.random.normal(k_feat, (B, T, N, Cin), jnp.float32)
    A = (jax.random.uniform(k_adj, (N, N)) > 0.5).astype(jnp.float32)
    A = jnp.maximum(A, A.T) * (1.0 - jnp.eye(N, dtype=jnp.float32))  # symmetric, no self-loop

    params = init_params(k_par, num_class, N, Cin, out_dim, hidden_dim, num_stacks)

    # One-time preprocessing (hoisted out of the per-forward path).
    prepped = jax.tree_util.tree_map(jax.block_until_ready,
                                     prepare_gcn_lstm(A, params))

    out = jax.block_until_ready(gcn_p_lstm_forward(features, prepped, num_class))
    assert out.shape == (B, num_class) and out.dtype == jnp.float32

    ref = _reference_forward(features, A, params)
    assert jnp.allclose(out, ref, atol=5e-2, rtol=5e-2), (
        f"mismatch vs reference, max |diff| = {jnp.max(jnp.abs(out - ref)):.3e}")
    print("KERNEL_OK")
</pallas_src>

<mosaic_0001>
module attributes {stable_mosaic.version = 11 : i64} {
  func.func @kernel(%arg0: memref<16x64xbf16, #tpu.memory_space<vmem>>, %arg1: memref<64x128xbf16, #tpu.memory_space<vmem>>, %arg2: memref<128x128xbf16, #tpu.memory_space<vmem>>, %arg3: memref<128x128xbf16, #tpu.memory_space<vmem>>, %arg4: memref<128x128xbf16, #tpu.memory_space<vmem>>, %arg5: memref<32x128xbf16, #tpu.memory_space<vmem>>, %arg6: memref<1x128xf32, #tpu.memory_space<vmem>>, %arg7: memref<32x128xf32, #tpu.memory_space<vmem>>, %arg8: memref<1x128xf32, #tpu.memory_space<vmem>>, %arg9: memref<2x128xf32, #tpu.memory_space<vmem>>) attributes {dimension_semantics = [], scalar_prefetch = 0 : i64, scratch_operands = 0 : i64, tpu.core_type = #tpu.core_type<tc>} {
    %c0 = arith.constant 0 : index
    %c0_0 = arith.constant 0 : index
    %0 = vector.load %arg0[%c0, %c0_0] : memref<16x64xbf16, #tpu.memory_space<vmem>>, vector<16x64xbf16>
    %c0_1 = arith.constant 0 : index
    %c0_2 = arith.constant 0 : index
    %1 = vector.load %arg1[%c0_1, %c0_2] : memref<64x128xbf16, #tpu.memory_space<vmem>>, vector<64x128xbf16>
    %cst = arith.constant dense<0.000000e+00> : vector<16x128xf32>
    %2 = tpu.matmul %0, %1, %cst {dimension_numbers = #tpu.dot_dimension_numbers<[1], [0], [0], [1], [0, 0, 1, 1], [], []>} : vector<16x64xbf16>, vector<64x128xbf16>, vector<16x128xf32> -> vector<16x128xf32>
    %cst_3 = arith.constant 0.000000e+00 : f32
    %3 = vector.broadcast %cst_3 : f32 to vector<16x128xf32>
    %4 = arith.maximumf %2, %3 : vector<16x128xf32>
    %5 = arith.truncf %4 : vector<16x128xf32> to vector<16x128xbf16>
    %c0_4 = arith.constant 0 : index
    %c0_5 = arith.constant 0 : index
    %6 = vector.load %arg2[%c0_4, %c0_5] : memref<128x128xbf16, #tpu.memory_space<vmem>>, vector<128x128xbf16>
    %cst_6 = arith.constant dense<0.000000e+00> : vector<16x128xf32>
    %7 = tpu.matmul %5, %6, %cst_6 {dimension_numbers = #tpu.dot_dimension_numbers<[1], [0], [0], [1], [0, 0, 1, 1], [], []>} : vector<16x128xbf16>, vector<128x128xbf16>, vector<16x128xf32> -> vector<16x128xf32>
    %cst_7 = arith.constant 0.000000e+00 : f32
    %8 = vector.broadcast %cst_7 : f32 to vector<16x128xf32>
    %9 = arith.maximumf %7, %8 : vector<16x128xf32>
    %10 = arith.truncf %9 : vector<16x128xf32> to vector<16x128xbf16>
    %c0_8 = arith.constant 0 : index
    %c0_9 = arith.constant 0 : index
    %11 = vector.load %arg3[%c0_8, %c0_9] : memref<128x128xbf16, #tpu.memory_space<vmem>>, vector<128x128xbf16>
    %cst_10 = arith.constant dense<0.000000e+00> : vector<16x128xf32>
    %12 = tpu.matmul %10, %11, %cst_10 {dimension_numbers = #tpu.dot_dimension_numbers<[1], [0], [0], [1], [0, 0, 1, 1], [], []>} : vector<16x128xbf16>, vector<128x128xbf16>, vector<16x128xf32> -> vector<16x128xf32>
    %cst_11 = arith.constant 0.000000e+00 : f32
    %13 = vector.broadcast %cst_11 : f32 to vector<16x128xf32>
    %14 = arith.maximumf %12, %13 : vector<16x128xf32>
    %15 = arith.truncf %14 : vector<16x128xf32> to vector<16x128xbf16>
    %c0_12 = arith.constant 0 : index
    %c0_13 = arith.constant 0 : index
    %16 = vector.load %arg4[%c0_12, %c0_13] : memref<128x128xbf16, #tpu.memory_space<vmem>>, vector<128x128xbf16>
    %cst_14 = arith.constant dense<0.000000e+00> : vector<16x128xf32>
    %17 = tpu.matmul %15, %16, %cst_14 {dimension_numbers = #tpu.dot_dimension_numbers<[1], [0], [0], [1], [0, 0, 1, 1], [], []>} : vector<16x128xbf16>, vector<128x128xbf16>, vector<16x128xf32> -> vector<16x128xf32>
    %c0_15 = arith.constant 0 : index
    %c0_16 = arith.constant 0 : index
    %18 = vector.load %arg6[%c0_15, %c0_16] : memref<1x128xf32, #tpu.memory_space<vmem>>, vector<1x128xf32>
    %19 = vector.broadcast %18 : vector<1x128xf32> to vector<16x128xf32>
    %20 = arith.addf %17, %19 : vector<16x128xf32>
    %c0_17 = arith.constant 0 : index
    %c0_18 = arith.constant 0 : index
    %21 = vector.load %arg5[%c0_17, %c0_18] : memref<32x128xbf16, #tpu.memory_space<vmem>>, vector<32x128xbf16>
    %cst_19 = arith.constant 0.000000e+00 : f32
    %22 = vector.broadcast %cst_19 : f32 to vector<2x32xf32>
    %cst_20 = arith.constant 0.000000e+00 : f32
    %23 = vector.broadcast %cst_20 : f32 to vector<2x32xf32>
    %24 = vector.extract_strided_slice %20 {offsets = [0, 0], sizes = [2, 128], strides = [1, 1]} : vector<16x128xf32> to vector<2x128xf32>
    %25 = arith.truncf %22 : vector<2x32xf32> to vector<2x32xbf16>
    %cst_21 = arith.constant dense<0.000000e+00> : vector<2x128xf32>
    %26 = tpu.matmul %25, %21, %cst_21 {dimension_numbers = #tpu.dot_dimension_numbers<[1], [0], [0], [1], [0, 0, 1, 1], [], []>} : vector<2x32xbf16>, vector<32x128xbf16>, vector<2x128xf32> -> vector<2x128xf32>
    %27 = arith.addf %24, %26 : vector<2x128xf32>
    %28 = arith.negf %27 : vector<2x128xf32>
    %29 = math.exp %28 : vector<2x128xf32>
    %cst_22 = arith.constant 1.000000e+00 : f32
    %30 = vector.broadcast %cst_22 : f32 to vector<2x128xf32>
    %31 = arith.addf %30, %29 : vector<2x128xf32>
    %32 = arith.divf %30, %31 : vector<2x128xf32>
    %33 = vector.extract_strided_slice %32 {offsets = [0, 0], sizes = [2, 32], strides = [1, 1]} : vector<2x128xf32> to vector<2x32xf32>
    %34 = vector.extract_strided_slice %32 {offsets = [0, 32], sizes = [2, 32], strides = [1, 1]} : vector<2x128xf32> to vector<2x32xf32>
    %35 = vector.extract_strided_slice %32 {offsets = [0, 64], sizes = [2, 32], strides = [1, 1]} : vector<2x128xf32> to vector<2x32xf32>
    %cst_23 = arith.constant 2.000000e+00 : f32
    %36 = vector.broadcast %cst_23 : f32 to vector<2x32xf32>
    %37 = arith.mulf %36, %35 : vector<2x32xf32>
    %cst_24 = arith.constant 1.000000e+00 : f32
    %38 = vector.broadcast %cst_24 : f32 to vector<2x32xf32>
    %39 = arith.subf %37, %38 : vector<2x32xf32>
    %40 = vector.extract_strided_slice %32 {offsets = [0, 96], sizes = [2, 32], strides = [1, 1]} : vector<2x128xf32> to vector<2x32xf32>
    %41 = arith.mulf %34, %23 : vector<2x32xf32>
    %42 = arith.mulf %33, %39 : vector<2x32xf32>
    %43 = arith.addf %41, %42 : vector<2x32xf32>
    %44 = math.tanh %43 : vector<2x32xf32>
    %45 = arith.mulf %40, %44 : vector<2x32xf32>
    %46 = vector.extract_strided_slice %20 {offsets = [2, 0], sizes = [2, 128], strides = [1, 1]} : vector<16x128xf32> to vector<2x128xf32>
    %47 = arith.truncf %45 : vector<2x32xf32> to vector<2x32xbf16>
    %cst_25 = arith.constant dense<0.000000e+00> : vector<2x128xf32>
    %48 = tpu.matmul %47, %21, %cst_25 {dimension_numbers = #tpu.dot_dimension_numbers<[1], [0], [0], [1], [0, 0, 1, 1], [], []>} : vector<2x32xbf16>, vector<32x128xbf16>, vector<2x128xf32> -> vector<2x128xf32>
    %49 = arith.addf %46, %48 : vector<2x128xf32>
    %50 = arith.negf %49 : vector<2x128xf32>
    %51 = math.exp %50 : vector<2x128xf32>
    %cst_26 = arith.constant 1.000000e+00 : f32
    %52 = vector.broadcast %cst_26 : f32 to vector<2x128xf32>
    %53 = arith.addf %52, %51 : vector<2x128xf32>
    %54 = arith.divf %52, %53 : vector<2x128xf32>
    %55 = vector.extract_strided_slice %54 {offsets = [0, 0], sizes = [2, 32], strides = [1, 1]} : vector<2x128xf32> to vector<2x32xf32>
    %56 = vector.extract_strided_slice %54 {offsets = [0, 32], sizes = [2, 32], strides = [1, 1]} : vector<2x128xf32> to vector<2x32xf32>
    %57 = vector.extract_strided_slice %54 {offsets = [0, 64], sizes = [2, 32], strides = [1, 1]} : vector<2x128xf32> to vector<2x32xf32>
    %cst_27 = arith.constant 2.000000e+00 : f32
    %58 = vector.broadcast %cst_27 : f32 to vector<2x32xf32>
    %59 = arith.mulf %58, %57 : vector<2x32xf32>
    %cst_28 = arith.constant 1.000000e+00 : f32
    %60 = vector.broadcast %cst_28 : f32 to vector<2x32xf32>
    %61 = arith.subf %59, %60 : vector<2x32xf32>
    %62 = vector.extract_strided_slice %54 {offsets = [0, 96], sizes = [2, 32], strides = [1, 1]} : vector<2x128xf32> to vector<2x32xf32>
    %63 = arith.mulf %56, %43 : vector<2x32xf32>
    %64 = arith.mulf %55, %61 : vector<2x32xf32>
    %65 = arith.addf %63, %64 : vector<2x32xf32>
    %66 = math.tanh %65 : vector<2x32xf32>
    %67 = arith.mulf %62, %66 : vector<2x32xf32>
    %68 = vector.extract_strided_slice %20 {offsets = [4, 0], sizes = [2, 128], strides = [1, 1]} : vector<16x128xf32> to vector<2x128xf32>
    %69 = arith.truncf %67 : vector<2x32xf32> to vector<2x32xbf16>
    %cst_29 = arith.constant dense<0.000000e+00> : vector<2x128xf32>
    %70 = tpu.matmul %69, %21, %cst_29 {dimension_numbers = #tpu.dot_dimension_numbers<[1], [0], [0], [1], [0, 0, 1, 1], [], []>} : vector<2x32xbf16>, vector<32x128xbf16>, vector<2x128xf32> -> vector<2x128xf32>
    %71 = arith.addf %68, %70 : vector<2x128xf32>
    %72 = arith.negf %71 : vector<2x128xf32>
    %73 = math.exp %72 : vector<2x128xf32>
    %cst_30 = arith.constant 1.000000e+00 : f32
    %74 = vector.broadcast %cst_30 : f32 to vector<2x128xf32>
    %75 = arith.addf %74, %73 : vector<2x128xf32>
    %76 = arith.divf %74, %75 : vector<2x128xf32>
    %77 = vector.extract_strided_slice %76 {offsets = [0, 0], sizes = [2, 32], strides = [1, 1]} : vector<2x128xf32> to vector<2x32xf32>
    %78 = vector.extract_strided_slice %76 {offsets = [0, 32], sizes = [2, 32], strides = [1, 1]} : vector<2x128xf32> to vector<2x32xf32>
    %79 = vector.extract_strided_slice %76 {offsets = [0, 64], sizes = [2, 32], strides = [1, 1]} : vector<2x128xf32> to vector<2x32xf32>
    %cst_31 = arith.constant 2.000000e+00 : f32
    %80 = vector.broadcast %cst_31 : f32 to vector<2x32xf32>
    %81 = arith.mulf %80, %79 : vector<2x32xf32>
    %cst_32 = arith.constant 1.000000e+00 : f32
    %82 = vector.broadcast %cst_32 : f32 to vector<2x32xf32>
    %83 = arith.subf %81, %82 : vector<2x32xf32>
    %84 = vector.extract_strided_slice %76 {offsets = [0, 96], sizes = [2, 32], strides = [1, 1]} : vector<2x128xf32> to vector<2x32xf32>
    %85 = arith.mulf %78, %65 : vector<2x32xf32>
    %86 = arith.mulf %77, %83 : vector<2x32xf32>
    %87 = arith.addf %85, %86 : vector<2x32xf32>
    %88 = math.tanh %87 : vector<2x32xf32>
    %89 = arith.mulf %84, %88 : vector<2x32xf32>
    %90 = vector.extract_strided_slice %20 {offsets = [6, 0], sizes = [2, 128], strides = [1, 1]} : vector<16x128xf32> to vector<2x128xf32>
    %91 = arith.truncf %89 : vector<2x32xf32> to vector<2x32xbf16>
    %cst_33 = arith.constant dense<0.000000e+00> : vector<2x128xf32>
    %92 = tpu.matmul %91, %21, %cst_33 {dimension_numbers = #tpu.dot_dimension_numbers<[1], [0], [0], [1], [0, 0, 1, 1], [], []>} : vector<2x32xbf16>, vector<32x128xbf16>, vector<2x128xf32> -> vector<2x128xf32>
    %93 = arith.addf %90, %92 : vector<2x128xf32>
    %94 = arith.negf %93 : vector<2x128xf32>
    %95 = math.exp %94 : vector<2x128xf32>
    %cst_34 = arith.constant 1.000000e+00 : f32
    %96 = vector.broadcast %cst_34 : f32 to vector<2x128xf32>
    %97 = arith.addf %96, %95 : vector<2x128xf32>
    %98 = arith.divf %96, %97 : vector<2x128xf32>
    %99 = vector.extract_strided_slice %98 {offsets = [0, 0], sizes = [2, 32], strides = [1, 1]} : vector<2x128xf32> to vector<2x32xf32>
    %100 = vector.extract_strided_slice %98 {offsets = [0, 32], sizes = [2, 32], strides = [1, 1]} : vector<2x128xf32> to vector<2x32xf32>
    %101 = vector.extract_strided_slice %98 {offsets = [0, 64], sizes = [2, 32], strides = [1, 1]} : vector<2x128xf32> to vector<2x32xf32>
    %cst_35 = arith.constant 2.000000e+00 : f32
    %102 = vector.broadcast %cst_35 : f32 to vector<2x32xf32>
    %103 = arith.mulf %102, %101 : vector<2x32xf32>
    %cst_36 = arith.constant 1.000000e+00 : f32
    %104 = vector.broadcast %cst_36 : f32 to vector<2x32xf32>
    %105 = arith.subf %103, %104 : vector<2x32xf32>
    %106 = vector.extract_strided_slice %98 {offsets = [0, 96], sizes = [2, 32], strides = [1, 1]} : vector<2x128xf32> to vector<2x32xf32>
    %107 = arith.mulf %100, %87 : vector<2x32xf32>
    %108 = arith.mulf %99, %105 : vector<2x32xf32>
    %109 = arith.addf %107, %108 : vector<2x32xf32>
    %110 = math.tanh %109 : vector<2x32xf32>
    %111 = arith.mulf %106, %110 : vector<2x32xf32>
    %112 = vector.extract_strided_slice %20 {offsets = [8, 0], sizes = [2, 128], strides = [1, 1]} : vector<16x128xf32> to vector<2x128xf32>
    %113 = arith.truncf %111 : vector<2x32xf32> to vector<2x32xbf16>
    %cst_37 = arith.constant dense<0.000000e+00> : vector<2x128xf32>
    %114 = tpu.matmul %113, %21, %cst_37 {dimension_numbers = #tpu.dot_dimension_numbers<[1], [0], [0], [1], [0, 0, 1, 1], [], []>} : vector<2x32xbf16>, vector<32x128xbf16>, vector<2x128xf32> -> vector<2x128xf32>
    %115 = arith.addf %112, %114 : vector<2x128xf32>
    %116 = arith.negf %115 : vector<2x128xf32>
    %117 = math.exp %116 : vector<2x128xf32>
    %cst_38 = arith.constant 1.000000e+00 : f32
    %118 = vector.broadcast %cst_38 : f32 to vector<2x128xf32>
    %119 = arith.addf %118, %117 : vector<2x128xf32>
    %120 = arith.divf %118, %119 : vector<2x128xf32>
    %121 = vector.extract_strided_slice %120 {offsets = [0, 0], sizes = [2, 32], strides = [1, 1]} : vector<2x128xf32> to vector<2x32xf32>
    %122 = vector.extract_strided_slice %120 {offsets = [0, 32], sizes = [2, 32], strides = [1, 1]} : vector<2x128xf32> to vector<2x32xf32>
    %123 = vector.extract_strided_slice %120 {offsets = [0, 64], sizes = [2, 32], strides = [1, 1]} : vector<2x128xf32> to vector<2x32xf32>
    %cst_39 = arith.constant 2.000000e+00 : f32
    %124 = vector.broadcast %cst_39 : f32 to vector<2x32xf32>
    %125 = arith.mulf %124, %123 : vector<2x32xf32>
    %cst_40 = arith.constant 1.000000e+00 : f32
    %126 = vector.broadcast %cst_40 : f32 to vector<2x32xf32>
    %127 = arith.subf %125, %126 : vector<2x32xf32>
    %128 = vector.extract_strided_slice %120 {offsets = [0, 96], sizes = [2, 32], strides = [1, 1]} : vector<2x128xf32> to vector<2x32xf32>
    %129 = arith.mulf %122, %109 : vector<2x32xf32>
    %130 = arith.mulf %121, %127 : vector<2x32xf32>
    %131 = arith.addf %129, %130 : vector<2x32xf32>
    %132 = math.tanh %131 : vector<2x32xf32>
    %133 = arith.mulf %128, %132 : vector<2x32xf32>
    %134 = vector.extract_strided_slice %20 {offsets = [10, 0], sizes = [2, 128], strides = [1, 1]} : vector<16x128xf32> to vector<2x128xf32>
    %135 = arith.truncf %133 : vector<2x32xf32> to vector<2x32xbf16>
    %cst_41 = arith.constant dense<0.000000e+00> : vector<2x128xf32>
    %136 = tpu.matmul %135, %21, %cst_41 {dimension_numbers = #tpu.dot_dimension_numbers<[1], [0], [0], [1], [0, 0, 1, 1], [], []>} : vector<2x32xbf16>, vector<32x128xbf16>, vector<2x128xf32> -> vector<2x128xf32>
    %137 = arith.addf %134, %136 : vector<2x128xf32>
    %138 = arith.negf %137 : vector<2x128xf32>
    %139 = math.exp %138 : vector<2x128xf32>
    %cst_42 = arith.constant 1.000000e+00 : f32
    %140 = vector.broadcast %cst_42 : f32 to vector<2x128xf32>
    %141 = arith.addf %140, %139 : vector<2x128xf32>
    %142 = arith.divf %140, %141 : vector<2x128xf32>
    %143 = vector.extract_strided_slice %142 {offsets = [0, 0], sizes = [2, 32], strides = [1, 1]} : vector<2x128xf32> to vector<2x32xf32>
    %144 = vector.extract_strided_slice %142 {offsets = [0, 32], sizes = [2, 32], strides = [1, 1]} : vector<2x128xf32> to vector<2x32xf32>
    %145 = vector.extract_strided_slice %142 {offsets = [0, 64], sizes = [2, 32], strides = [1, 1]} : vector<2x128xf32> to vector<2x32xf32>
    %cst_43 = arith.constant 2.000000e+00 : f32
    %146 = vector.broadcast %cst_43 : f32 to vector<2x32xf32>
    %147 = arith.mulf %146, %145 : vector<2x32xf32>
    %cst_44 = arith.constant 1.000000e+00 : f32
    %148 = vector.broadcast %cst_44 : f32 to vector<2x32xf32>
    %149 = arith.subf %147, %148 : vector<2x32xf32>
    %150 = vector.extract_strided_slice %142 {offsets = [0, 96], sizes = [2, 32], strides = [1, 1]} : vector<2x128xf32> to vector<2x32xf32>
    %151 = arith.mulf %144, %131 : vector<2x32xf32>
    %152 = arith.mulf %143, %149 : vector<2x32xf32>
    %153 = arith.addf %151, %152 : vector<2x32xf32>
    %154 = math.tanh %153 : vector<2x32xf32>
    %155 = arith.mulf %150, %154 : vector<2x32xf32>
    %156 = vector.extract_strided_slice %20 {offsets = [12, 0], sizes = [2, 128], strides = [1, 1]} : vector<16x128xf32> to vector<2x128xf32>
    %157 = arith.truncf %155 : vector<2x32xf32> to vector<2x32xbf16>
    %cst_45 = arith.constant dense<0.000000e+00> : vector<2x128xf32>
    %158 = tpu.matmul %157, %21, %cst_45 {dimension_numbers = #tpu.dot_dimension_numbers<[1], [0], [0], [1], [0, 0, 1, 1], [], []>} : vector<2x32xbf16>, vector<32x128xbf16>, vector<2x128xf32> -> vector<2x128xf32>
    %159 = arith.addf %156, %158 : vector<2x128xf32>
    %160 = arith.negf %159 : vector<2x128xf32>
    %161 = math.exp %160 : vector<2x128xf32>
    %cst_46 = arith.constant 1.000000e+00 : f32
    %162 = vector.broadcast %cst_46 : f32 to vector<2x128xf32>
    %163 = arith.addf %162, %161 : vector<2x128xf32>
    %164 = arith.divf %162, %163 : vector<2x128xf32>
    %165 = vector.extract_strided_slice %164 {offsets = [0, 0], sizes = [2, 32], strides = [1, 1]} : vector<2x128xf32> to vector<2x32xf32>
    %166 = vector.extract_strided_slice %164 {offsets = [0, 32], sizes = [2, 32], strides = [1, 1]} : vector<2x128xf32> to vector<2x32xf32>
    %167 = vector.extract_strided_slice %164 {offsets = [0, 64], sizes = [2, 32], strides = [1, 1]} : vector<2x128xf32> to vector<2x32xf32>
    %cst_47 = arith.constant 2.000000e+00 : f32
    %168 = vector.broadcast %cst_47 : f32 to vector<2x32xf32>
    %169 = arith.mulf %168, %167 : vector<2x32xf32>
    %cst_48 = arith.constant 1.000000e+00 : f32
    %170 = vector.broadcast %cst_48 : f32 to vector<2x32xf32>
    %171 = arith.subf %169, %170 : vector<2x32xf32>
    %172 = vector.extract_strided_slice %164 {offsets = [0, 96], sizes = [2, 32], strides = [1, 1]} : vector<2x128xf32> to vector<2x32xf32>
    %173 = arith.mulf %166, %153 : vector<2x32xf32>
    %174 = arith.mulf %165, %171 : vector<2x32xf32>
    %175 = arith.addf %173, %174 : vector<2x32xf32>
    %176 = math.tanh %175 : vector<2x32xf32>
    %177 = arith.mulf %172, %176 : vector<2x32xf32>
    %178 = vector.extract_strided_slice %20 {offsets = [14, 0], sizes = [2, 128], strides = [1, 1]} : vector<16x128xf32> to vector<2x128xf32>
    %179 = arith.truncf %177 : vector<2x32xf32> to vector<2x32xbf16>
    %cst_49 = arith.constant dense<0.000000e+00> : vector<2x128xf32>
    %180 = tpu.matmul %179, %21, %cst_49 {dimension_numbers = #tpu.dot_dimension_numbers<[1], [0], [0], [1], [0, 0, 1, 1], [], []>} : vector<2x32xbf16>, vector<32x128xbf16>, vector<2x128xf32> -> vector<2x128xf32>
    %181 = arith.addf %178, %180 : vector<2x128xf32>
    %182 = arith.negf %181 : vector<2x128xf32>
    %183 = math.exp %182 : vector<2x128xf32>
    %cst_50 = arith.constant 1.000000e+00 : f32
    %184 = vector.broadcast %cst_50 : f32 to vector<2x128xf32>
    %185 = arith.addf %184, %183 : vector<2x128xf32>
    %186 = arith.divf %184, %185 : vector<2x128xf32>
    %187 = vector.extract_strided_slice %186 {offsets = [0, 0], sizes = [2, 32], strides = [1, 1]} : vector<2x128xf32> to vector<2x32xf32>
    %188 = vector.extract_strided_slice %186 {offsets = [0, 32], sizes = [2, 32], strides = [1, 1]} : vector<2x128xf32> to vector<2x32xf32>
    %189 = vector.extract_strided_slice %186 {offsets = [0, 64], sizes = [2, 32], strides = [1, 1]} : vector<2x128xf32> to vector<2x32xf32>
    %cst_51 = arith.constant 2.000000e+00 : f32
    %190 = vector.broadcast %cst_51 : f32 to vector<2x32xf32>
    %191 = arith.mulf %190, %189 : vector<2x32xf32>
    %cst_52 = arith.constant 1.000000e+00 : f32
    %192 = vector.broadcast %cst_52 : f32 to vector<2x32xf32>
    %193 = arith.subf %191, %192 : vector<2x32xf32>
    %194 = vector.extract_strided_slice %186 {offsets = [0, 96], sizes = [2, 32], strides = [1, 1]} : vector<2x128xf32> to vector<2x32xf32>
    %195 = arith.mulf %188, %175 : vector<2x32xf32>
    %196 = arith.mulf %187, %193 : vector<2x32xf32>
    %197 = arith.addf %195, %196 : vector<2x32xf32>
    %198 = math.tanh %197 : vector<2x32xf32>
    %199 = arith.mulf %194, %198 : vector<2x32xf32>
    %c0_53 = arith.constant 0 : index
    %c0_54 = arith.constant 0 : index
    %200 = vector.load %arg7[%c0_53, %c0_54] : memref<32x128xf32, #tpu.memory_space<vmem>>, vector<32x128xf32>
    %cst_55 = arith.constant dense<0.000000e+00> : vector<2x128xf32>
    %201 = tpu.matmul %199, %200, %cst_55 {dimension_numbers = #tpu.dot_dimension_numbers<[1], [0], [0], [1], [0, 0, 1, 1], [], []>} : vector<2x32xf32>, vector<32x128xf32>, vector<2x128xf32> -> vector<2x128xf32>
    %c0_56 = arith.constant 0 : index
    %c0_57 = arith.constant 0 : index
    %202 = vector.load %arg8[%c0_56, %c0_57] : memref<1x128xf32, #tpu.memory_space<vmem>>, vector<1x128xf32>
    %203 = vector.broadcast %202 : vector<1x128xf32> to vector<2x128xf32>
    %204 = arith.addf %201, %203 : vector<2x128xf32>
    %c0_58 = arith.constant 0 : index
    %c0_59 = arith.constant 0 : index
    %205 = vector.load %arg9[%c0_58, %c0_59] : memref<2x128xf32, #tpu.memory_space<vmem>>, vector<2x128xf32>
    tpu.vector_store %arg9[%c0_58, %c0_59], %204 {strides = array<i32>} : memref<2x128xf32, #tpu.memory_space<vmem>>, vector<2x128xf32>,
    return
  }
}

</mosaic_0001>

<bundles_post_ra>
// kernel: gcn_p_lstm_forward.1
= control target key start
LH: loop header
LB: loop body
LE: loop exit
PB: predicated region body
PF: predicated region fallthrough
CT: control target
= control target key end

     0   :  { %v1574_v1 = vmov 0.0   ;;  %vm1575_vm0 = vmmov 0   ;;  %vm73_vm1 = vcmask 523264   ;;  %s1896_s0 = inlined_call_operand.vmem [shape: bf16[16,64], index: 0, kind: input, shape index: {}]   ;;  %s1897_s1 = inlined_call_operand.vmem [shape: bf16[64,128], index: 1, kind: input, shape index: {}]   ;;  %s1898_s2 = inlined_call_operand.vmem [shape: bf16[128,128], index: 2, kind: input, shape index: {}]   ;;  %s1899_s3 = inlined_call_operand.vmem [shape: bf16[128,128], index: 3, kind: input, shape index: {}]   ;;  %s1900_s4 = inlined_call_operand.vmem [shape: bf16[128,128], index: 4, kind: input, shape index: {}]   ;;  %s1901_s5 = inlined_call_operand.vmem [shape: bf16[32,128], index: 5, kind: input, shape index: {}]   ;;  %s1902_s6 = inlined_call_operand.vmem [shape: f32[1,128], index: 6, kind: input, shape index: {}]   ;;  %s1903_s7 = inlined_call_operand.vmem [shape: f32[32,128], index: 7, kind: input, shape index: {}]   ;;  %s1904_s8 = inlined_call_operand.vmem [shape: f32[1,128], index: 8, kind: input, shape index: {}]   ;;  %s1905_s9 = inlined_call_operand.hbm [shape: f32[2,128], index: 9, kind: output, shape index: {}]  }
   0x1   :  { %v1471_v0 = vld [vmem:[%s1897_s1] sm:$0xff]   ;;  %1311 = vmatprep.subr.bf16.mxu0 %v1574_v1  ;;  %1323 = vmatprep.subr.bf16.mxu1 %v1574_v1  ;;  %v1472_v2 = vld [vmem:[%s1897_s1 + $0x8] sm:$0xff]   ;;  %v1473_v4 = vld [vmem:[%s1897_s1 + $0x10] sm:$0xff]  }
   0x2   :  { %1312 = vmatpush3.bf16.msra.mxu0 %v1471_v0  ;;  %1319 = vmatprep.mubr.msk.bf16.mxu0 %vm1575_vm0, %v1574_v1  ;;  %v1476_v3 = vld [vmem:[%s1898_s2] sm:$0xff]   ;;  %v1477_v5 = vld [vmem:[%s1898_s2 + $0x8] sm:$0xff]   ;;  %v1474_v6 = vld [vmem:[%s1897_s1 + $0x18] sm:$0xff]  }
   0x3   :  { %1313 = vmatprep.subr.bf16.mxu0 %v1574_v1  ;;  %1339 = vmatprep.mubr.msk.bf16.mxu1 %vm1575_vm0, %v1574_v1  ;;  %v1478_v7 = vld [vmem:[%s1898_s2 + $0x10] sm:$0xff]   ;;  %v1475_v8 = vld [vmem:[%s1896_s0] sm:$0xff]   ;;  %v1479_v9 = vld [vmem:[%s1898_s2 + $0x18] sm:$0xff]  }
   0x4   :  { %1324 = vmatpush3.bf16.msra.mxu1 %v1476_v3  ;;  %v1480_v10 = vld [vmem:[%s1898_s2 + $0x20] sm:$0xff]   ;;  %v1481_v11 = vld [vmem:[%s1898_s2 + $0x28] sm:$0xff]  }
   0x5   :  { %1325 = vmatprep.subr.bf16.mxu1 %v1574_v1 }
   0x6   :  { %1314 = vmatpush3.bf16.msra.mxu0 %v1472_v2 }
   0x7   :  { %1315 = vmatprep.subr.bf16.mxu0 %v1574_v1 }
   0x8   :  { %1326 = vmatpush3.bf16.msra.mxu1 %v1477_v5 }
   0x9   :  { %1327 = vmatprep.subr.bf16.mxu1 %v1574_v1 }
   0xa   :  { %1316 = vmatpush3.bf16.msra.mxu0 %v1473_v4 }
   0xb   :  { %1317 = vmatprep.subr.bf16.mxu0 %v1574_v1 }
   0xc   :  { %1328 = vmatpush3.bf16.msra.mxu1 %v1478_v7 }
   0xd   :  { %1329 = vmatprep.subr.bf16.mxu1 %v1574_v1 }
   0xe   :  { %1318 = vmatpush3.bf16.msra.mxu0 %v1474_v6 }
   0xf   :  { %1343 = vmatprep.subr.bf16.mxu0 %v1574_v1 }
  0x10   :  { %1330 = vmatpush3.bf16.msra.mxu1 %v1479_v9 }
  0x11   :  { %1320 = vmatmul.mubr.msk.bf16.vlgmr.msra.gmra.mrb[0].mxu0 %vm73_vm1, %v1475_v8  ;;  %1331 = vmatprep.subr.bf16.mxu1 %v1574_v1 }
  0x12   :  { %1359 = vmatprep.mubr.msk.bf16.mxu0 %vm1575_vm0, %v1574_v1 }
  0x14   :  { %1332 = vmatpush3.bf16.msra.mxu1 %v1480_v10 }
  0x15   :  { %1333 = vmatprep.subr.bf16.mxu1 %v1574_v1 }
  0x16   :  { %14 = vsyncpa [#allocation3], 0  ;;  %v1482_v12 = vld [vmem:[%s1898_s2 + $0x30] sm:$0xff]   ;;  %v1483_v13 = vld [vmem:[%s1898_s2 + $0x38] sm:$0xff]   ;;  %v1576_v46 = vmov 0   ;;  %s1577_s22 = smov 64  }
  0x17   :  { %v1484_v14 = vld [vmem:[%s1899_s3] sm:$0xff]   ;;  %v1485_v15 = vld [vmem:[%s1899_s3 + $0x8] sm:$0xff]   ;;  %v1486_v16 = vld [vmem:[%s1899_s3 + $0x10] sm:$0xff]   ;;  %vm465_vm2 = vcmask 261120  }
  0x18   :  { %1334 = vmatpush3.bf16.msra.mxu1 %v1481_v11  ;;  %1344 = vmatpush3.bf16.msra.mxu0 %v1484_v14  ;;  %v1487_v17 = vld [vmem:[%s1899_s3 + $0x18] sm:$0xff]   ;;  %v1488_v18 = vld [vmem:[%s1899_s3 + $0x20] sm:$0xff]   ;;  %v1489_v19 = vld [vmem:[%s1899_s3 + $0x28] sm:$0xff]  }
  0x19   :  { %1335 = vmatprep.subr.bf16.mxu1 %v1574_v1  ;;  %1345 = vmatprep.subr.bf16.mxu0 %v1574_v1  ;;  %v1490_v27 = vld [vmem:[%s1899_s3 + $0x30] sm:$0xff]   ;;  %v1491_v28 = vld [vmem:[%s1899_s3 + $0x38] sm:$0xff]   ;;  %v1492_v29 = vld [vmem:[%s1900_s4] sm:$0xff]  }
  0x1a   :  { %v1493_v30 = vld [vmem:[%s1900_s4 + $0x8] sm:$0xff]   ;;  %v1494_v31 = vld [vmem:[%s1900_s4 + $0x10] sm:$0xff]   ;;  %v1495_v32 = vld [vmem:[%s1900_s4 + $0x18] sm:$0xff]  }
  0x1b   :  { %v1496_v33 = vld [vmem:[%s1900_s4 + $0x20] sm:$0xff]   ;;  %v1497_v34 = vld [vmem:[%s1900_s4 + $0x28] sm:$0xff]   ;;  %v1499_v43 = vld [vmem:[%s1900_s4 + $0x30] sm:$0xff]  }
  0x1c   :  { %1336 = vmatpush3.bf16.msra.mxu1 %v1482_v12  ;;  %1346 = vmatpush3.bf16.msra.mxu0 %v1485_v15  ;;  %v1751_v41 = vld [vmem:[%s1901_s5] sm:$0xff]   ;;  %v1764_v44 = vld [vmem:[%s1901_s5 + $0x8] sm:$0xff]   ;;  %v1501_v45 = vld [vmem:[%s1900_s4 + $0x38] sm:$0xff]  }
  0x1d   :  { %1337 = vmatprep.subr.bf16.mxu1 %v1574_v1  ;;  %1347 = vmatprep.subr.bf16.mxu0 %v1574_v1  ;;  %v1214_v58 = vld [vmem:[%s1902_s6] ss:$0 sm:$0xff]  ;;  %s1578_s6 = smov 32  }
  0x20   :  { %1338 = vmatpush3.bf16.msra.mxu1 %v1483_v13  ;;  %1348 = vmatpush3.bf16.msra.mxu0 %v1486_v16 }
  0x21   :  { %1363 = vmatprep.subr.bf16.mxu1 %v1574_v1  ;;  %1349 = vmatprep.subr.bf16.mxu0 %v1574_v1 }
  0x24   :  { %1350 = vmatpush3.bf16.msra.mxu0 %v1487_v17 }
  0x25   :  { %1351 = vmatprep.subr.bf16.mxu0 %v1574_v1 }
  0x28   :  { %1352 = vmatpush3.bf16.msra.mxu0 %v1488_v18 }
  0x29   :  { %1353 = vmatprep.subr.bf16.mxu0 %v1574_v1 }
  0x2c   :  { %1354 = vmatpush3.bf16.msra.mxu0 %v1489_v19 }
  0x2d   :  { %1355 = vmatprep.subr.bf16.mxu0 %v1574_v1 }
  0x30   :  { %1356 = vmatpush3.bf16.msra.mxu0 %v1490_v27 }
  0x31   :  { %1357 = vmatprep.subr.bf16.mxu0 %v1574_v1 }
  0x34   :  { %1358 = vmatpush3.bf16.msra.mxu0 %v1491_v28 }
  0x35   :  { %1383 = vmatprep.subr.bf16.mxu0 %v1574_v1 }
  0xe4   :  { %v111_v20 = vpop.f32.mrb[0].mxu0 }
  0xe5   :  { %v1321_v21 = vpop.f32.mrb[1].mxu0  ;;  %v118_v23 = vmax.f32 %v111_v20, 0.0 }
  0xe6   :  { %v114_v22 = vpop.f32.mrb[2].mxu0 }
  0xe7   :  { %v119_v24 = vmax.f32 %v114_v22, 0.0  ;;  %v1322_v25 = vpop.f32.mrb[3].mxu0 }
  0xe9   :  { %v120_v26 = vpack.c.bf16 %v119_v24, %v118_v23 }
  0xeb   :  { %1340 = vmatmul.mubr.bf16.vlgmr.msra.gmra.mrb[0].mxu1 %v120_v26 }
  0xec   :  { %1379 = vmatprep.mubr.msk.bf16.mxu1 %vm1575_vm0, %v1574_v1  ;;  %1364 = vmatpush3.bf16.msra.mxu1 %v1492_v29 }
  0xed   :  { %1365 = vmatprep.subr.bf16.mxu1 %v1574_v1 }
  0xf0   :  { %1366 = vmatpush3.bf16.msra.mxu1 %v1493_v30 }
  0xf1   :  { %1367 = vmatprep.subr.bf16.mxu1 %v1574_v1 }
  0xf4   :  { %1368 = vmatpush3.bf16.msra.mxu1 %v1494_v31 }
  0xf5   :  { %1369 = vmatprep.subr.bf16.mxu1 %v1574_v1 }
  0xf8   :  { %1370 = vmatpush3.bf16.msra.mxu1 %v1495_v32 }
  0xf9   :  { %1371 = vmatprep.subr.bf16.mxu1 %v1574_v1 }
  0xfc   :  { %1372 = vmatpush3.bf16.msra.mxu1 %v1496_v33 }
  0xfd   :  { %1373 = vmatprep.subr.bf16.mxu1 %v1574_v1 }
 0x100   :  { %1374 = vmatpush3.bf16.msra.mxu1 %v1497_v34 }
 0x101   :  { %1375 = vmatprep.subr.bf16.mxu1 %v1574_v1 }
 0x104   :  { %1376 = vmatpush3.bf16.msra.mxu1 %v1499_v43 }
 0x105   :  { %1377 = vmatprep.subr.bf16.mxu1 %v1574_v1 }
 0x108   :  { %1378 = vmatpush3.bf16.msra.mxu1 %v1501_v45 }
 0x109   :  { %1407 = vmatprep.subr.bf16.mxu1 %v1574_v1 }
 0x1be   :  { %v219_v35 = vpop.f32.mrb[0].mxu1 }
 0x1bf   :  { %v1341_v36 = vpop.f32.mrb[1].mxu1  ;;  %v226_v38 = vmax.f32 %v219_v35, 0.0 }
 0x1c0   :  { %v222_v37 = vpop.f32.mrb[2].mxu1 }
 0x1c1   :  { %v227_v39 = vmax.f32 %v222_v37, 0.0  ;;  %v1342_v40 = vpop.f32.mrb[3].mxu1 }
 0x1c3   :  { %v228_v42 = vpack.c.bf16 %v227_v39, %v226_v38 }
 0x1c5   :  { %1360 = vmatmul.mubr.bf16.vlgmr.msra.gmra.mrb[4].mxu0 %v228_v42 }
 0x1c6   :  { %1384 = vmatpush3.bf16.msra.mxu0 %v1751_v41  ;;  %1387 = vmatprep.mubr.msk.bf16.mxu0 %vm1575_vm0, %v1574_v1 }
 0x1c7   :  { %1385 = vmatprep.subr.bf16.mxu0 %v1574_v1 }
 0x1ca   :  { %1386 = vmatpush3.bf16.msra.mxu0 %v1764_v44 }
 0x1cb   :  { %1391 = vmatprep.subr.bf16.mxu0 %v1574_v1 }
 0x1cd   :  { %1388 = vmatmul.mubr.bf16.vlgmr.msra.gmra.mrb[8].mxu0 %v1576_v46 }
 0x1ce   :  { %1392 = vmatpush3.bf16.msra.mxu0 %v1751_v41  ;;  %1395 = vmatprep.mubr.msk.bf16.mxu0 %vm1575_vm0, %v1574_v1 }
 0x1cf   :  { %1393 = vmatprep.subr.bf16.mxu0 %v1574_v1 }
 0x1d2   :  { %1394 = vmatpush3.bf16.msra.mxu0 %v1764_v44 }
 0x1d3   :  { %1399 = vmatprep.subr.bf16.mxu0 %v1574_v1 }
 0x298   :  { %v327_v47 = vpop.f32.mrb[4].mxu0 }
 0x299   :  { %v1361_v48 = vpop.f32.mrb[5].mxu0  ;;  %v334_v50 = vmax.f32 %v327_v47, 0.0 }
 0x29a   :  { %v330_v49 = vpop.f32.mrb[6].mxu0 }
 0x29b   :  { %v335_v51 = vmax.f32 %v330_v49, 0.0  ;;  %v1362_v52 = vpop.f32.mrb[7].mxu0 }
 0x29d   :  { %v336_v53 = vpack.c.bf16 %v335_v51, %v334_v50 }
 0x29f   :  { %1380 = vmatmul.mubr.bf16.vlgmr.msra.gmra.mrb[4].mxu1 %v336_v53 }
 0x2a0   :  { %1408 = vmatpush3.bf16.msra.mxu1 %v1751_v41  ;;  %1411 = vmatprep.mubr.msk.bf16.mxu1 %vm1575_vm0, %v1574_v1  ;;  %v503_v54 = vpop.f32.mrb[8].mxu0 }
 0x2a1   :  { %1409 = vmatprep.subr.bf16.mxu1 %v1574_v1  ;;  %v1389_v55 = vpop.f32.mrb[9].mxu0 }
 0x2a2   :  { %v506_v56 = vpop.f32.mrb[10].mxu0 }
 0x2a3   :  { %v1390_v57 = vpop.f32.mrb[11].mxu0 }
 0x2a4   :  { %1410 = vmatpush3.bf16.msra.mxu1 %v1764_v44 }
 0x2a5   :  { %1423 = vmatprep.subr.bf16.mxu1 %v1574_v1 }
 0x372   :  { %v442_v59 = vpop.f32.mrb[4].mxu1 }
 0x373   :  { %v1787_v60 = vadd.f32 %v1214_v58, %v442_v59  ;;  %v1381_v61 = vpop.f32.mrb[5].mxu1 }
 0x374   :  { %v445_v62 = vpop.f32.mrb[6].mxu1 }
 0x375   :  { %v509_v63 = vadd.f32 %v503_v54, %v1787_v60  ;;  %v1790_v0 = vadd.f32 %v1214_v58, %v445_v62  ;;  %v1382_v2 = vpop.f32.mrb[7].mxu1 }
 0x377   :  { %v1225_v3 = vmul.f32 -1.442695, %v509_v63 }
 0x379   :  { %1502 = vpow2.f32 %v1225_v3 }
 0x383   :  { %v1503_v4 = vpop.eup %1502 }
 0x384   :  { %v513_v5 = vadd.f32 1.0, %v1503_v4 }
 0x386   :  { %1504 = vrcp.f32 %v513_v5 }
 0x390   :  { %v1505_v6 = vpop.eup %1504 }
 0x391   :  { %v516_v7 = vmul.f32 2.0, %v1505_v6  ;;  %v518_v11 = vmul.f32 0.0, %v1505_v6 }
 0x393   :  { %v1226_v8 = vadd.f32 -1.0, %v516_v7 }
 0x395   :  { %520 = vrot.lane.b32.xlu0 %v1226_v8, %s1577_s22 }
 0x407   :  { %v521_v9 = vpop.permute.xlu0 %520 }
 0x408   :  { %v523_v10 = vmul.f32 %v1505_v6, %v521_v9 }
 0x40a   :  { %525 = vrot.lane.b32.xlu0 %v523_v10, %s1578_s6 }
 0x47c   :  { %v526_v12 = vpop.permute.xlu0 %525 }
 0x47d   :  { %v528_v13 = vadd.f32 %v526_v12, %v518_v11 }
 0x47f   :  { %1506 = vtanh.f32 %v528_v13  ;;  %v595_v33 = vrot.slane %v528_v13, 6 }
 0x489   :  { %v1507_v14 = vpop.eup %1506 }
 0x48a   :  { %531 = vrot.lane.b32.xlu1 %v1507_v14, %s1577_s22 }
 0x4fc   :  { %v532_v15 = vpop.permute.xlu1 %531 }
 0x4fd   :  { %v534_v16 = vmul.f32 %v1505_v6, %v532_v15 }
 0x4ff   :  { %v535_v17 = vpack.c.bf16 %v534_v16, %v534_v16 }
 0x501   :  { %537 = vrot.lane.b32.xlu1 %v535_v17, %s1578_s6 }
 0x573   :  { %v538_v18 = vpop.permute.xlu1 %537 }
 0x574   :  { %1396 = vmatmul.mubr.msk.bf16.vlgmr.msra.gmra.mrb[12].mxu0 %vm465_vm2, %v538_v18 }
 0x575   :  { %1400 = vmatpush3.bf16.msra.mxu0 %v1751_v41  ;;  %1403 = vmatprep.mubr.msk.bf16.mxu0 %vm1575_vm0, %v1574_v1 }
 0x576   :  { %1401 = vmatprep.subr.bf16.mxu0 %v1574_v1 }
 0x579   :  { %1402 = vmatpush3.bf16.msra.mxu0 %v1764_v44 }
 0x57a   :  { %1415 = vmatprep.subr.bf16.mxu0 %v1574_v1 }
 0x647   :  { %v576_v19 = vpop.f32.mrb[12].mxu0 }
 0x648   :  { %v583_v20 = vrot.slane %v576_v19, 6  ;;  %v1397_v21 = vpop.f32.mrb[13].mxu0 }
 0x649   :  { %v579_v22 = vpop.f32.mrb[14].mxu0 }
 0x64a   :  { %v585_v23 = vadd.f32 %v583_v20, %v1787_v60  ;;  %v1398_v24 = vpop.f32.mrb[15].mxu0 }
 0x64c   :  { %v1228_v25 = vmul.f32 -1.442695, %v585_v23 }
 0x64e   :  { %1508 = vpow2.f32 %v1228_v25 }
 0x658   :  { %v1509_v26 = vpop.eup %1508 }
 0x659   :  { %v589_v27 = vadd.f32 1.0, %v1509_v26 }
 0x65b   :  { %1510 = vrcp.f32 %v589_v27 }
 0x665   :  { %v1511_v28 = vpop.eup %1510 }
 0x666   :  { %v592_v29 = vmul.f32 2.0, %v1511_v28  ;;  %v597_v34 = vmul.f32 %v1511_v28, %v595_v33 }
 0x668   :  { %v1229_v30 = vadd.f32 -1.0, %v592_v29 }
 0x66a   :  { %599 = vrot.lane.b32.xlu0 %v1229_v30, %s1577_s22 }
 0x6dc   :  { %v600_v31 = vpop.permute.xlu0 %599 }
 0x6dd   :  { %v602_v32 = vmul.f32 %v1511_v28, %v600_v31 }
 0x6df   :  { %604 = vrot.lane.b32.xlu1 %v602_v32, %s1578_s6 }
 0x751   :  { %v605_v35 = vpop.permute.xlu1 %604 }
 0x752   :  { %v607_v36 = vadd.f32 %v605_v35, %v597_v34 }
 0x754   :  { %1512 = vtanh.f32 %v607_v36  ;;  %v675_v59 = vrot.slane %v607_v36, 6 }
 0x75e   :  { %v1513_v37 = vpop.eup %1512 }
 0x75f   :  { %610 = vrot.lane.b32.xlu0 %v1513_v37, %s1577_s22 }
 0x7d1   :  { %v611_v38 = vpop.permute.xlu0 %610 }
 0x7d2   :  { %v613_v39 = vmul.f32 %v1511_v28, %v611_v38 }
 0x7d4   :  { %v614_v40 = vpack.c.bf16 %v613_v39, %v613_v39 }
 0x7d6   :  { %v616_v42 = vrot.slane %v614_v40, 1 }
 0x7d8   :  { %617 = vrot.lane.b32.xlu1 %v616_v42, %s1578_s6 }
 0x84a   :  { %v618_v43 = vpop.permute.xlu1 %617 }
 0x84b   :  { %1404 = vmatmul.mubr.msk.bf16.vlgmr.msra.gmra.mrb[16].mxu0 %vm465_vm2, %v618_v43 }
 0x84c   :  { %1416 = vmatpush3.bf16.msra.mxu0 %v1751_v41  ;;  %1419 = vmatprep.mubr.msk.bf16.mxu0 %vm1575_vm0, %v1574_v1 }
 0x84d   :  { %1417 = vmatprep.subr.bf16.mxu0 %v1574_v1 }
 0x850   :  { %1418 = vmatpush3.bf16.msra.mxu0 %v1764_v44 }
 0x851   :  { %1431 = vmatprep.subr.bf16.mxu0 %v1574_v1 }
 0x91e   :  { %v656_v45 = vpop.f32.mrb[16].mxu0 }
 0x91f   :  { %v663_v46 = vrot.slane %v656_v45, 4  ;;  %v1405_v47 = vpop.f32.mrb[17].mxu0 }
 0x920   :  { %v659_v48 = vpop.f32.mrb[18].mxu0 }
 0x921   :  { %v665_v49 = vadd.f32 %v663_v46, %v1787_v60  ;;  %v1406_v50 = vpop.f32.mrb[19].mxu0 }
 0x923   :  { %v1231_v51 = vmul.f32 -1.442695, %v665_v49 }
 0x925   :  { %1514 = vpow2.f32 %v1231_v51 }
 0x92f   :  { %v1515_v52 = vpop.eup %1514 }
 0x930   :  { %v669_v53 = vadd.f32 1.0, %v1515_v52 }
 0x932   :  { %1516 = vrcp.f32 %v669_v53 }
 0x93c   :  { %v1517_v54 = vpop.eup %1516 }
 0x93d   :  { %v672_v55 = vmul.f32 2.0, %v1517_v54  ;;  %v677_v61 = vmul.f32 %v1517_v54, %v675_v59 }
 0x93f   :  { %v1232_v56 = vadd.f32 -1.0, %v672_v55 }
 0x941   :  { %679 = vrot.lane.b32.xlu0 %v1232_v56, %s1577_s22 }
 0x9b3   :  { %v680_v57 = vpop.permute.xlu0 %679 }
 0x9b4   :  { %v682_v58 = vmul.f32 %v1517_v54, %v680_v57 }
 0x9b6   :  { %684 = vrot.lane.b32.xlu1 %v682_v58, %s1578_s6 }
 0xa28   :  { %v685_v62 = vpop.permute.xlu1 %684 }
 0xa29   :  { %v687_v63 = vadd.f32 %v685_v62, %v677_v61 }
 0xa2b   :  { %1518 = vtanh.f32 %v687_v63  ;;  %v755_v22 = vrot.slane %v687_v63, 6 }
 0xa35   :  { %v1519_v2 = vpop.eup %1518 }
 0xa36   :  { %690 = vrot.lane.b32.xlu0 %v1519_v2, %s1577_s22 }
 0xaa8   :  { %v691_v3 = vpop.permute.xlu0 %690 }
 0xaa9   :  { %v693_v4 = vmul.f32 %v1517_v54, %v691_v3 }
 0xaab   :  { %v694_v5 = vpack.c.bf16 %v693_v4, %v693_v4 }
 0xaad   :  { %v696_v6 = vrot.slane %v694_v5, 2 }
 0xaaf   :  { %697 = vrot.lane.b32.xlu1 %v696_v6, %s1578_s6 }
 0xb21   :  { %v698_v7 = vpop.permute.xlu1 %697 }
 0xb22   :  { %1412 = vmatmul.mubr.msk.bf16.vlgmr.msra.gmra.mrb[8].mxu1 %vm465_vm2, %v698_v7 }
 0xb23   :  { %1424 = vmatpush3.bf16.msra.mxu1 %v1751_v41  ;;  %1427 = vmatprep.mubr.msk.bf16.mxu1 %vm1575_vm0, %v1574_v1 }
 0xb24   :  { %1425 = vmatprep.subr.bf16.mxu1 %v1574_v1 }
 0xb27   :  { %1426 = vmatpush3.bf16.msra.mxu1 %v1764_v44 }
 0xb28   :  { %1439 = vmatprep.subr.bf16.mxu1 %v1574_v1 }
 0xbf5   :  { %v736_v8 = vpop.f32.mrb[8].mxu1 }
 0xbf6   :  { %v743_v9 = vrot.slane %v736_v8, 2  ;;  %v1413_v10 = vpop.f32.mrb[9].mxu1 }
 0xbf7   :  { %v739_v11 = vpop.f32.mrb[10].mxu1 }
 0xbf8   :  { %v745_v12 = vadd.f32 %v743_v9, %v1787_v60  ;;  %v1414_v13 = vpop.f32.mrb[11].mxu1 }
 0xbfa   :  { %v1234_v14 = vmul.f32 -1.442695, %v745_v12 }
 0xbfc   :  { %1520 = vpow2.f32 %v1234_v14 }
 0xc06   :  { %v1521_v15 = vpop.eup %1520 }
 0xc07   :  { %v749_v16 = vadd.f32 1.0, %v1521_v15 }
 0xc09   :  { %1522 = vrcp.f32 %v749_v16 }
 0xc13   :  { %v1523_v17 = vpop.eup %1522 }
 0xc14   :  { %v752_v18 = vmul.f32 2.0, %v1523_v17  ;;  %v757_v23 = vmul.f32 %v1523_v17, %v755_v22 }
 0xc16   :  { %v1235_v19 = vadd.f32 -1.0, %v752_v18 }
 0xc18   :  { %759 = vrot.lane.b32.xlu0 %v1235_v19, %s1577_s22 }
 0xc8a   :  { %v760_v20 = vpop.permute.xlu0 %759 }
 0xc8b   :  { %v762_v21 = vmul.f32 %v1523_v17, %v760_v20 }
 0xc8d   :  { %764 = vrot.lane.b32.xlu1 %v762_v21, %s1578_s6 }
 0xcff   :  { %v765_v24 = vpop.permute.xlu1 %764 }
 0xd00   :  { %v767_v25 = vadd.f32 %v765_v24, %v757_v23 }
 0xd02   :  { %1524 = vtanh.f32 %v767_v25  ;;  %v832_v46 = vrot.slane %v767_v25, 6 }
 0xd0c   :  { %v1525_v60 = vpop.eup %1524 }
 0xd0d   :  { %770 = vrot.lane.b32.xlu0 %v1525_v60, %s1577_s22 }
 0xd7f   :  { %v771_v26 = vpop.permute.xlu0 %770 }
 0xd80   :  { %v773_v27 = vmul.f32 %v1523_v17, %v771_v26 }
 0xd82   :  { %v774_v28 = vpack.c.bf16 %v773_v27, %v773_v27 }
 0xd84   :  { %v776_v29 = vrot.slane %v774_v28, 3 }
 0xd86   :  { %777 = vrot.lane.b32.xlu1 %v776_v29, %s1578_s6 }
 0xdf8   :  { %v778_v30 = vpop.permute.xlu1 %777 }
 0xdf9   :  { %1420 = vmatmul.mubr.msk.bf16.vlgmr.msra.gmra.mrb[20].mxu0 %vm465_vm2, %v778_v30 }
 0xdfa   :  { %1432 = vmatpush3.bf16.msra.mxu0 %v1751_v41  ;;  %1435 = vmatprep.mubr.msk.bf16.mxu0 %vm1575_vm0, %v1574_v1 }
 0xdfb   :  { %1433 = vmatprep.subr.bf16.mxu0 %v1574_v1 }
 0xdfe   :  { %1434 = vmatpush3.bf16.msra.mxu0 %v1764_v44 }
 0xecc   :  { %v816_v31 = vpop.f32.mrb[20].mxu0 }
 0xecd   :  { %v822_v32 = vadd.f32 %v816_v31, %v1790_v0  ;;  %v1421_v33 = vpop.f32.mrb[21].mxu0 }
 0xece   :  { %v819_v34 = vpop.f32.mrb[22].mxu0 }
 0xecf   :  { %v1237_v35 = vmul.f32 -1.442695, %v822_v32  ;;  %v1422_v36 = vpop.f32.mrb[23].mxu0 }
 0xed1   :  { %1526 = vpow2.f32 %v1237_v35 }
 0xedb   :  { %v1527_v37 = vpop.eup %1526 }
 0xedc   :  { %v826_v38 = vadd.f32 1.0, %v1527_v37 }
 0xede   :  { %1528 = vrcp.f32 %v826_v38 }
 0xee8   :  { %v1529_v39 = vpop.eup %1528 }
 0xee9   :  { %v829_v40 = vmul.f32 2.0, %v1529_v39  ;;  %v834_v47 = vmul.f32 %v1529_v39, %v832_v46 }
 0xeeb   :  { %v1238_v42 = vadd.f32 -1.0, %v829_v40 }
 0xeed   :  { %836 = vrot.lane.b32.xlu0 %v1238_v42, %s1577_s22 }
 0xf5f   :  { %v837_v43 = vpop.permute.xlu0 %836 }
 0xf60   :  { %v839_v45 = vmul.f32 %v1529_v39, %v837_v43 }
 0xf62   :  { %841 = vrot.lane.b32.xlu1 %v839_v45, %s1578_s6 }
 0xfd4   :  { %v842_v48 = vpop.permute.xlu1 %841 }
 0xfd5   :  { %v844_v49 = vadd.f32 %v842_v48, %v834_v47 }
 0xfd7   :  { %1530 = vtanh.f32 %v844_v49 }
 0xfe1   :  { %v1531_v50 = vpop.eup %1530 }
 0xfe2   :  { %847 = vrot.lane.b32.xlu0 %v1531_v50, %s1577_s22 }
0x1054   :  { %v848_v51 = vpop.permute.xlu0 %847 }
0x1055   :  { %v850_v52 = vmul.f32 %v1529_v39, %v848_v51 }
0x1057   :  { %v851_v53 = vpack.c.bf16 %v850_v52, %v850_v52 }
0x1059   :  { %853 = vrot.lane.b32.xlu1 %v851_v53, %s1578_s6 }
0x10cb   :  { %v854_v54 = vpop.permute.xlu1 %853 }
0x10cc   :  { %1428 = vmatmul.mubr.msk.bf16.vlgmr.msra.gmra.mrb[12].mxu1 %vm465_vm2, %v854_v54 }
0x10cd   :  { %1440 = vmatpush3.bf16.msra.mxu1 %v1751_v41  ;;  %1443 = vmatprep.mubr.msk.bf16.mxu1 %vm1575_vm0, %v1574_v1 }
0x10ce   :  { %1441 = vmatprep.subr.bf16.mxu1 %v1574_v1 }
0x10d1   :  { %1442 = vmatpush3.bf16.msra.mxu1 %v1764_v44  ;;  %v911_v44 = vrot.slane %v844_v49, 6 }
0x119f   :  { %v892_v55 = vpop.f32.mrb[12].mxu1 }
0x11a0   :  { %v899_v56 = vrot.slane %v892_v55, 6  ;;  %v1429_v57 = vpop.f32.mrb[13].mxu1 }
0x11a1   :  { %v895_v58 = vpop.f32.mrb[14].mxu1 }
0x11a2   :  { %v901_v59 = vadd.f32 %v899_v56, %v1790_v0  ;;  %v1430_v61 = vpop.f32.mrb[15].mxu1  ;;  %v1091_v58 = vld [vmem:[%s1903_s7 + $0x8] sm:$0xff] }
0x11a3   :  { %v1579_v61 = vmov 0.0|0.0  }
0x11a4   :  { %v1240_v62 = vmul.f32 -1.442695, %v901_v59  ;;  %v1092_v59 = vld [vmem:[%s1903_s7 + $0x10] sm:$0xff]  ;;  %1458 = vmatprep.subr.bf16.mxu0 %v1579_v61 }
0x11a6   :  { %1532 = vpow2.f32 %v1240_v62 }
0x11b0   :  { %v1533_v63 = vpop.eup %1532 }
0x11b1   :  { %v905_v2 = vadd.f32 1.0, %v1533_v63  ;;  %v1093_v63 = vld [vmem:[%s1903_s7 + $0x18] sm:$0xff] }
0x11b3   :  { %1534 = vrcp.f32 %v905_v2  ;;  %v1462_v2 = vpack.c.bf16 %v1093_v63, %v1092_v59 }
0x11bd   :  { %v1535_v41 = vpop.eup %1534 }
0x11be   :  { %v908_v3 = vmul.f32 2.0, %v1535_v41  ;;  %v913_v7 = vmul.f32 %v1535_v41, %v911_v44  ;;  %v1248_v44 = vld [vmem:[%s1904_s8] ss:$0 sm:$0xff] }
0x11c0   :  { %v1241_v4 = vadd.f32 -1.0, %v908_v3 }
0x11c2   :  { %915 = vrot.lane.b32.xlu0 %v1241_v4, %s1577_s22 }
0x1234   :  { %v916_v5 = vpop.permute.xlu0 %915 }
0x1235   :  { %v918_v6 = vmul.f32 %v1535_v41, %v916_v5 }
0x1237   :  { %920 = vrot.lane.b32.xlu1 %v918_v6, %s1578_s6 }
0x12a9   :  { %v921_v8 = vpop.permute.xlu1 %920 }
0x12aa   :  { %v923_v9 = vadd.f32 %v921_v8, %v913_v7 }
0x12ac   :  { %1536 = vtanh.f32 %v923_v9 }
0x12b6   :  { %v1537_v10 = vpop.eup %1536 }
0x12b7   :  { %926 = vrot.lane.b32.xlu0 %v1537_v10, %s1577_s22 }
0x1329   :  { %v927_v11 = vpop.permute.xlu0 %926 }
0x132a   :  { %v929_v12 = vmul.f32 %v1535_v41, %v927_v11 }
0x132c   :  { %v930_v13 = vpack.c.bf16 %v929_v12, %v929_v12 }
0x132e   :  { %v932_v14 = vrot.slane %v930_v13, 1 }
0x1330   :  { %933 = vrot.lane.b32.xlu1 %v932_v14, %s1578_s6 }
0x13a2   :  { %v934_v15 = vpop.permute.xlu1 %933 }
0x13a3   :  { %1436 = vmatmul.mubr.msk.bf16.vlgmr.msra.gmra.mrb[24].mxu0 %vm465_vm2, %v934_v15 }
0x13a4   :  { %1455 = vmatprep.mubr.msk.f32.mxu0 %vm1575_vm0, %v1574_v1  ;;  %v991_v1 = vrot.slane %v923_v9, 6 }
0x1476   :  { %v972_v16 = vpop.f32.mrb[24].mxu0 }
0x1477   :  { %v979_v17 = vrot.slane %v972_v16, 4  ;;  %v1437_v18 = vpop.f32.mrb[25].mxu0 }
0x1478   :  { %v975_v19 = vpop.f32.mrb[26].mxu0 }
0x1479   :  { %v981_v20 = vadd.f32 %v979_v17, %v1790_v0  ;;  %v1438_v21 = vpop.f32.mrb[27].mxu0 }
0x147b   :  { %v1243_v22 = vmul.f32 -1.442695, %v981_v20 }
0x147d   :  { %1538 = vpow2.f32 %v1243_v22 }
0x1487   :  { %v1539_v23 = vpop.eup %1538 }
0x1488   :  { %v985_v24 = vadd.f32 1.0, %v1539_v23 }
0x148a   :  { %1540 = vrcp.f32 %v985_v24 }
0x1494   :  { %v1541_v25 = vpop.eup %1540 }
0x1495   :  { %v988_v60 = vmul.f32 2.0, %v1541_v25  ;;  %v993_v29 = vmul.f32 %v1541_v25, %v991_v1 }
0x1497   :  { %v1244_v26 = vadd.f32 -1.0, %v988_v60 }
0x1499   :  { %995 = vrot.lane.b32.xlu0 %v1244_v26, %s1577_s22 }
0x150b   :  { %v996_v27 = vpop.permute.xlu0 %995 }
0x150c   :  { %v998_v28 = vmul.f32 %v1541_v25, %v996_v27 }
0x150e   :  { %1000 = vrot.lane.b32.xlu1 %v998_v28, %s1578_s6 }
0x1580   :  { %v1001_v30 = vpop.permute.xlu1 %1000 }
0x1581   :  { %v1003_v31 = vadd.f32 %v1001_v30, %v993_v29 }
0x1583   :  { %1542 = vtanh.f32 %v1003_v31  ;;  %v1071_v54 = vrot.slane %v1003_v31, 6 }
0x158d   :  { %v1543_v32 = vpop.eup %1542 }
0x158e   :  { %1006 = vrot.lane.b32.xlu0 %v1543_v32, %s1577_s22 }
0x1600   :  { %v1007_v33 = vpop.permute.xlu0 %1006 }
0x1601   :  { %v1009_v34 = vmul.f32 %v1541_v25, %v1007_v33 }
0x1603   :  { %v1010_v35 = vpack.c.bf16 %v1009_v34, %v1009_v34 }
0x1605   :  { %v1012_v36 = vrot.slane %v1010_v35, 2 }
0x1607   :  { %1013 = vrot.lane.b32.xlu1 %v1012_v36, %s1578_s6 }
0x1679   :  { %v1014_v37 = vpop.permute.xlu1 %1013 }
0x167a   :  { %1444 = vmatmul.mubr.msk.bf16.vlgmr.msra.gmra.mrb[16].mxu1 %vm465_vm2, %v1014_v37 }
0x174d   :  { %v1052_v38 = vpop.f32.mrb[16].mxu1 }
0x174e   :  { %v1059_v39 = vrot.slane %v1052_v38, 2  ;;  %v1445_v40 = vpop.f32.mrb[17].mxu1 }
0x174f   :  { %v1055_v42 = vpop.f32.mrb[18].mxu1 }
0x1750   :  { %v1061_v43 = vadd.f32 %v1059_v39, %v1790_v0  ;;  %v1446_v45 = vpop.f32.mrb[19].mxu1  ;;  %v1090_v0 = vld [vmem:[%s1903_s7] sm:$0xff]  ;;  %s1580_s7 = smov [#allocation2]  }
0x1751   :  { %v1459_v62 = vpack.c.bf16 %v1091_v58, %v1090_v0  ;;  %s1184_s3 = sshll.u32 %s1580_s7, 4  ;;  %s1185_s3 = int_to_ptr.vmem [resolvable:$true] %s1184_s3 }
0x1752   :  { %v1246_v46 = vmul.f32 -1.442695, %v1061_v43  ;;  %s1550_s10 = scalar_lea.vmem %s1185_s3, 32  ;;  %p1555_p1 = scmp.lt.s32.totalorder %s1185_s3, %s1185_s3 }
0x1753   :  { %1460 = vmatpush3.bf16.msra.mxu0 %v1459_v62  ;;  %p1551_p0 = scmp.ne.s32.totalorder %s1185_s3, %s1550_s10  ;;  %p1556_p2 = scmp.lt.s32.totalorder %s1550_s10, %s1550_s10 }
0x1754   :  { %1544 = vpow2.f32 %v1246_v46  ;;  %1461 = vmatprep.subr.bf16.mxu0 %v1579_v61 }
0x1755   :  { %p1557_p3 = por %p1556_p2, %p1555_p1 }
0x1757   :  { %1463 = vmatpush3.bf16.msra.mxu0 %v1462_v2  ;;  %p1558_p4 = pnand %p1557_p3, %p1551_p0 }
0x175e   :  { %v1545_v47 = vpop.eup %1544 }
0x175f   :  { %v1065_v48 = vadd.f32 1.0, %v1545_v47 }
0x1761   :  { %1546 = vrcp.f32 %v1065_v48 }
0x176b   :  { %v1547_v49 = vpop.eup %1546 }
0x176c   :  { %v1068_v50 = vmul.f32 2.0, %v1547_v49  ;;  %v1073_v55 = vmul.f32 %v1547_v49, %v1071_v54 }
0x176e   :  { %v1247_v51 = vadd.f32 -1.0, %v1068_v50 }
0x1770   :  { %1075 = vrot.lane.b32.xlu0 %v1247_v51, %s1577_s22 }
0x17e2   :  { %v1076_v52 = vpop.permute.xlu0 %1075 }
0x17e3   :  { %v1078_v53 = vmul.f32 %v1547_v49, %v1076_v52 }
0x17e5   :  { %1080 = vrot.lane.b32.xlu1 %v1078_v53, %s1578_s6 }
0x1857   :  { %v1081_v56 = vpop.permute.xlu1 %1080 }
0x1858   :  { %v1083_v57 = vadd.f32 %v1081_v56, %v1073_v55 }
0x185a   :  { %1548 = vtanh.f32 %v1083_v57 }
0x1864   :  { %v1549_v41 = vpop.eup %1548 }
0x1865   :  { %1086 = vrot.lane.b32.xlu0 %v1549_v41, %s1577_s22 }
0x18d7   :  { %v1087_v3 = vpop.permute.xlu0 %1086 }
0x18d8   :  { %v1089_v4 = vmul.f32 %v1547_v49, %v1087_v3 }
0x18da   :  { %v1102_v5 = vrot.slane %v1089_v4, 6 }
0x18dc   :  { %1103 = vrot.lane.b32.xlu1 %v1102_v5, %s1578_s6 }
0x194e   :  { %v1104_v6 = vpop.permute.xlu1 %1103 }
0x194f   :  { %1456 = vmatmul.mubr.msk.f32.vlgmr.msra.gmra.mrb[28].mxu0 %vm465_vm2, %v1104_v6 }
0x1a22   :  { %v1173_v7 = vpop.f32.mrb[28].mxu0 }
0x1a23   :  { %v1174_v8 = vadd.f32 %v1248_v44, %v1173_v7  ;;  %v1457_v9 = vpop.f32.mrb[29].mxu0 }
0x1a25   :  { %1177 = vst [vmem:[#allocation2] sm:$0x3] %v1174_v8 }
0x1a26   :  { %1561 = shalt.err (!%p1558_p4)
}
0x1a27   :  { %s1562_s13 = scalar_lea.hbm %s1905_s9, 32 }
0x1a28   :  { %p1563_p5 = scmp.ne.s32.totalorder %s1905_s9, %s1562_s13  ;;  %p1566_p6 = scmp.lt.u32.totalorder %s1562_s13, %s1905_s9 }
0x1a2a   :  { %p1568_p7 = pnand %p1566_p6, %p1563_p5 }
0x1a2c   :  { %1571 = shalt.err (!%p1568_p7)
}
0x1a2d   :  { %1187 = dma.vmem_to_hbm [thread:$0]  %s1185_s3, 32, %s1905_s9, [#allocation3]  }
0x1a2e   :  { %1572 = dma.done.wait [#allocation3], 32  }
0x1a2f   :  { %1573 = vsyncadd [#allocation3], 4294967264 }
0x1a30   :  { %1191 = vsyncpa [#allocation3], 1 }

</bundles_post_ra>
